<compile_context>
chip_gen: v7x
topology: tpu7x:2x2x1
jax: 0.10.0
libtpu: 0.0.40
codegen_flags: <defaults>
</compile_context>

<pallas_src>
import jax
import jax.numpy as jnp
from jax.experimental import pallas as pl
from jax.experimental.pallas import tpu as pltpu


def _round_up(v, m):
    return (v + m - 1) // m * m


def _mlp_head_kernel(x_ref, w1_ref, b1_ref, w2_ref, b2_ref, o_ref, acc_ref):
    """One (ROI-tile, K-tile) grid step of the fused 2-layer MLP head.

    Grid = (N_tiles, K_tiles).  K (fc1 reduction over D) is the innermost,
    "arbitrary" axis; acc_ref carries the fc1 partial sums across it.
    """
    k = pl.program_id(1)

    @pl.when(k == 0)
    def _init():
        acc_ref[...] = jnp.zeros_like(acc_ref)

    # fc1 partial matmul: bf16 operands, f32 accumulation on the MXU.
    acc_ref[...] += jnp.dot(x_ref[...], w1_ref[...],
                            preferred_element_type=jnp.float32)

    @pl.when(k == pl.num_programs(1) - 1)
    def _epilogue():
        # fc1 bias + ReLU only once, in the epilogue.
        h1 = jnp.maximum(acc_ref[...] + b1_ref[...], 0.0)
        # fc2 (+bias, ReLU): feed the MXU bf16, accumulate f32.
        h2 = jnp.dot(h1.astype(w2_ref.dtype), w2_ref[...],
                     preferred_element_type=jnp.float32) + b2_ref[...]
        o_ref[...] = jnp.maximum(h2, 0.0).astype(o_ref.dtype)


def make_roi_2mlp_head(w1, b1, w2, b2, *, tk=512, tn=128, lane=128):
    """Build a jitted forward closure for the 2-MLP head.

    w1: (D, H) fc1 weight stored (in, out); b1: (H,); w2: (H, H); b2: (H,).
    Weights are padded + cast to bf16 exactly once, here.
    """
    d, h = w1.shape
    assert w2.shape == (h, h) and b1.shape == (h,) and b2.shape == (h,)

    tk = min(tk, _round_up(d, lane))      # fc1 K tile (multiple of 128)
    dp = _round_up(d, tk)                 # padded fc1 input dim
    hp = _round_up(h, lane)               # padded hidden dim
    k_tiles = dp // tk

    w1p = jnp.zeros((dp, hp), jnp.bfloat16).at[:d, :h].set(w1.astype(jnp.bfloat16))
    w2p = jnp.zeros((hp, hp), jnp.bfloat16).at[:h, :h].set(w2.astype(jnp.bfloat16))
    b1p = jnp.zeros((1, hp), jnp.float32).at[0, :h].set(b1.astype(jnp.float32))
    b2p = jnp.zeros((1, hp), jnp.float32).at[0, :h].set(b2.astype(jnp.float32))

    def forward(x_nchw):
        """x_nchw: (N, C, R, R) pooled ROI features (roi_xform output, NCHW).
        Returns (N, H) float32 == relu(fc2(relu(fc1(x.view(N, -1)))))."""
        n, c, r1, r2 = x_nchw.shape
        assert c * r1 * r2 == d, "feature dim mismatch with prepared fc1 weight"

        tn_eff = min(tn, _round_up(n, 8))     # ROI tile (multiple of 8 sublanes)
        np_pad = _round_up(n, tn_eff)
        n_tiles = np_pad // tn_eff

        # Same flattening order as torch `x.view(batch, -1)` on NCHW; pad N/D
        # with zeros (zero rows/cols contribute nothing), feed the MXU bf16.
        x_flat = x_nchw.reshape(n, d).astype(jnp.bfloat16)
        x_pad = jnp.pad(x_flat, ((0, np_pad - n), (0, dp - d)))

        cost = pl.CostEstimate(
            flops=2 * np_pad * (dp * hp + hp * hp),
            transcendentals=0,
            bytes_accessed=(x_pad.size * 2 + w1p.size * 2 + w2p.size * 2
                            + 2 * hp * 4 + np_pad * hp * 4),
        )

        out = pl.pallas_call(
            _mlp_head_kernel,
            out_shape=jax.ShapeDtypeStruct((np_pad, hp), jnp.float32),
            grid_spec=pltpu.PrefetchScalarGridSpec(
                num_scalar_prefetch=0,
                grid=(n_tiles, k_tiles),
                in_specs=[
                    pl.BlockSpec((tn_eff, tk), lambda i, k: (i, k)),  # x tile
                    pl.BlockSpec((tk, hp), lambda i, k: (k, 0)),      # w1 K-slab
                    pl.BlockSpec((1, hp), lambda i, k: (0, 0)),       # b1 (resident)
                    pl.BlockSpec((hp, hp), lambda i, k: (0, 0)),      # w2 (resident)
                    pl.BlockSpec((1, hp), lambda i, k: (0, 0)),       # b2 (resident)
                ],
                out_specs=pl.BlockSpec((tn_eff, hp), lambda i, k: (i, 0)),
                scratch_shapes=[pltpu.VMEM((tn_eff, hp), jnp.float32)],
            ),
            compiler_params=pltpu.CompilerParams(
                dimension_semantics=("parallel", "arbitrary"),
            ),
            cost_estimate=cost,
        )(x_pad, w1p, b1p, w2p, b2p)

        return out[:n, :h]

    return jax.jit(forward)


def _xavier_fill(key, fan_in, fan_out):
    # Detectron XavierFill == uniform(-s, s) with s = sqrt(3 / fan_in)
    scale = jnp.sqrt(3.0 / fan_in)
    return jax.random.uniform(key, (fan_in, fan_out), jnp.float32,
                              minval=-scale, maxval=scale)


if __name__ == "__main__":
    # cfg-style constants (small MLP_HEAD_DIM / ROI_XFORM_RESOLUTION analogs)
    num_rois = 8          # number of ROIs after roi_xform
    dim_in = 4
    roi_size = 8
    hidden_dim = 128      # cfg.FAST_RCNN.MLP_HEAD_DIM (small synthetic value)
    in_dim = dim_in * roi_size ** 2   # 256

    key = jax.random.PRNGKey(0)
    kx, k1, k2 = jax.random.split(key, 3)

    # synthetic "roi_xform(x, rpn_ret)" output: (N_rois, dim_in, roi, roi), NCHW
    x = jax.random.normal(kx, (num_rois, dim_in, roi_size, roi_size), jnp.float32)

    # fc1 / fc2 parameters (XavierFill weights, zero biases), stored as (in, out)
    w1 = _xavier_fill(k1, in_dim, hidden_dim)
    b1 = jnp.zeros((hidden_dim,), jnp.float32)
    w2 = _xavier_fill(k2, in_dim if False else hidden_dim, hidden_dim)
    b2 = jnp.zeros((hidden_dim,), jnp.float32)

    # Pre-pad / pre-cast the static weights once and get a jitted forward fn.
    mlp_head = make_roi_2mlp_head(w1, b1, w2, b2)

    out = mlp_head(x)
    out = jax.block_until_ready(out)

    # sanity check against plain-JAX f32 reference (bf16 operands => loose tol)
    ref = jnp.maximum(x.reshape(num_rois, -1) @ w1 + b1, 0.0)
    ref = jnp.maximum(ref @ w2 + b2, 0.0)
    assert out.shape == (num_rois, hidden_dim)
    assert jnp.allclose(out, ref, atol=3e-2, rtol=3e-2), (
        float(jnp.max(jnp.abs(out - ref))))

    print("KERNEL_OK")
</pallas_src>

<mosaic_0001>
module attributes {stable_mosaic.version = 11 : i64} {
  func.func @_mlp_head_kernel(%arg0: i32, %arg1: i32, %arg2: memref<8x256xbf16, #tpu.memory_space<vmem>>, %arg3: memref<256x128xbf16, #tpu.memory_space<vmem>>, %arg4: memref<1x128xf32, #tpu.memory_space<vmem>>, %arg5: memref<128x128xbf16, #tpu.memory_space<vmem>>, %arg6: memref<1x128xf32, #tpu.memory_space<vmem>>, %arg7: memref<8x128xf32, #tpu.memory_space<vmem>>, %arg8: memref<8x128xf32, #tpu.memory_space<vmem>>) attributes {dimension_semantics = [#tpu.dimension_semantics<parallel>, #tpu.dimension_semantics<arbitrary>], iteration_bounds = array<i64: 1, 1>, scalar_prefetch = 0 : i64, scratch_operands = 1 : i64, tpu.core_type = #tpu.core_type<tc>, window_params = [{transform_indices = @transform_0, window_bounds = array<i64: 8, 256>}, {transform_indices = @transform_1, window_bounds = array<i64: 256, 128>}, {pipeline_mode = #tpu.pipeline_mode<synchronous>, transform_indices = @transform_2, window_bounds = array<i64: 1, 128>}, {pipeline_mode = #tpu.pipeline_mode<synchronous>, transform_indices = @transform_3, window_bounds = array<i64: 128, 128>}, {pipeline_mode = #tpu.pipeline_mode<synchronous>, transform_indices = @transform_4, window_bounds = array<i64: 1, 128>}, {transform_indices = @transform_5, window_bounds = array<i64: 8, 128>}]} {
    %c0_i32 = arith.constant 0 : i32
    %0 = arith.cmpi eq, %arg1, %c0_i32 : i32
    %1 = arith.extui %0 : i1 to i32
    %c0_i32_0 = arith.constant 0 : i32
    %2 = arith.cmpi ne, %1, %c0_i32_0 : i32
    scf.if %2 {
      %cst_10 = arith.constant 0.000000e+00 : f32
      %12 = vector.broadcast %cst_10 : f32 to vector<8x128xf32>
      %c0_11 = arith.constant 0 : index
      %c0_12 = arith.constant 0 : index
      %13 = vector.load %arg8[%c0_11, %c0_12] : memref<8x128xf32, #tpu.memory_space<vmem>>, vector<8x128xf32>
      tpu.vector_store %arg8[%c0_11, %c0_12], %12 {strides = array<i32>} : memref<8x128xf32, #tpu.memory_space<vmem>>, vector<8x128xf32>,
    } else {
    }
    %c0 = arith.constant 0 : index
    %c0_1 = arith.constant 0 : index
    %3 = vector.load %arg8[%c0, %c0_1] : memref<8x128xf32, #tpu.memory_space<vmem>>, vector<8x128xf32>
    %c0_2 = arith.constant 0 : index
    %c0_3 = arith.constant 0 : index
    %4 = vector.load %arg2[%c0_2, %c0_3] : memref<8x256xbf16, #tpu.memory_space<vmem>>, vector<8x256xbf16>
    %c0_4 = arith.constant 0 : index
    %c0_5 = arith.constant 0 : index
    %5 = vector.load %arg3[%c0_4, %c0_5] : memref<256x128xbf16, #tpu.memory_space<vmem>>, vector<256x128xbf16>
    %cst = arith.constant dense<0.000000e+00> : vector<8x128xf32>
    %6 = tpu.matmul %4, %5, %cst {dimension_numbers = #tpu.dot_dimension_numbers<[1], [0], [0], [1], [0, 0, 1, 1], [], []>} : vector<8x256xbf16>, vector<256x128xbf16>, vector<8x128xf32> -> vector<8x128xf32>
    %7 = arith.addf %3, %6 : vector<8x128xf32>
    %c0_6 = arith.constant 0 : index
    %c0_7 = arith.constant 0 : index
    %8 = vector.load %arg8[%c0_6, %c0_7] : memref<8x128xf32, #tpu.memory_space<vmem>>, vector<8x128xf32>
    tpu.vector_store %arg8[%c0_6, %c0_7], %7 {strides = array<i32>} : memref<8x128xf32, #tpu.memory_space<vmem>>, vector<8x128xf32>,
    %c0_i32_8 = arith.constant 0 : i32
    %9 = arith.cmpi eq, %arg1, %c0_i32_8 : i32
    %10 = arith.extui %9 : i1 to i32
    %c0_i32_9 = arith.constant 0 : i32
    %11 = arith.cmpi ne, %10, %c0_i32_9 : i32
    scf.if %11 {
      %c0_10 = arith.constant 0 : index
      %c0_11 = arith.constant 0 : index
      %12 = vector.load %arg8[%c0_10, %c0_11] : memref<8x128xf32, #tpu.memory_space<vmem>>, vector<8x128xf32>
      %c0_12 = arith.constant 0 : index
      %c0_13 = arith.constant 0 : index
      %13 = vector.load %arg4[%c0_12, %c0_13] : memref<1x128xf32, #tpu.memory_space<vmem>>, vector<1x128xf32>
      %14 = vector.broadcast %13 : vector<1x128xf32> to vector<8x128xf32>
      %15 = arith.addf %12, %14 : vector<8x128xf32>
      %cst_14 = arith.constant 0.000000e+00 : f32
      %16 = vector.broadcast %cst_14 : f32 to vector<8x128xf32>
      %17 = arith.maximumf %15, %16 : vector<8x128xf32>
      %18 = arith.truncf %17 : vector<8x128xf32> to vector<8x128xbf16>
      %c0_15 = arith.constant 0 : index
      %c0_16 = arith.constant 0 : index
      %19 = vector.load %arg5[%c0_15, %c0_16] : memref<128x128xbf16, #tpu.memory_space<vmem>>, vector<128x128xbf16>
      %cst_17 = arith.constant dense<0.000000e+00> : vector<8x128xf32>
      %20 = tpu.matmul %18, %19, %cst_17 {dimension_numbers = #tpu.dot_dimension_numbers<[1], [0], [0], [1], [0, 0, 1, 1], [], []>} : vector<8x128xbf16>, vector<128x128xbf16>, vector<8x128xf32> -> vector<8x128xf32>
      %c0_18 = arith.constant 0 : index
      %c0_19 = arith.constant 0 : index
      %21 = vector.load %arg6[%c0_18, %c0_19] : memref<1x128xf32, #tpu.memory_space<vmem>>, vector<1x128xf32>
      %22 = vector.broadcast %21 : vector<1x128xf32> to vector<8x128xf32>
      %23 = arith.addf %20, %22 : vector<8x128xf32>
      %cst_20 = arith.constant 0.000000e+00 : f32
      %24 = vector.broadcast %cst_20 : f32 to vector<8x128xf32>
      %25 = arith.maximumf %23, %24 : vector<8x128xf32>
      %c0_21 = arith.constant 0 : index
      %c0_22 = arith.constant 0 : index
      %26 = vector.load %arg7[%c0_21, %c0_22] : memref<8x128xf32, #tpu.memory_space<vmem>>, vector<8x128xf32>
      tpu.vector_store %arg7[%c0_21, %c0_22], %25 {strides = array<i32>} : memref<8x128xf32, #tpu.memory_space<vmem>>, vector<8x128xf32>,
    } else {
    }
    return
  }
  func.func @transform_0(%arg0: i32, %arg1: i32) -> (i32, i32) {
    %c0_i32 = arith.constant 0 : i32
    return %arg0, %arg1 : i32, i32
  }
  func.func @transform_1(%arg0: i32, %arg1: i32) -> (i32, i32) {
    %c0_i32 = arith.constant 0 : i32
    %c0_i32_0 = arith.constant 0 : i32
    return %arg1, %c0_i32 : i32, i32
  }
  func.func @transform_2(%arg0: i32, %arg1: i32) -> (i32, i32) {
    %c0_i32 = arith.constant 0 : i32
    %c0_i32_0 = arith.constant 0 : i32
    %c0_i32_1 = arith.constant 0 : i32
    return %c0_i32, %c0_i32_0 : i32, i32
  }
  func.func @transform_3(%arg0: i32, %arg1: i32) -> (i32, i32) {
    %c0_i32 = arith.constant 0 : i32
    %c0_i32_0 = arith.constant 0 : i32
    %c0_i32_1 = arith.constant 0 : i32
    return %c0_i32, %c0_i32_0 : i32, i32
  }
  func.func @transform_4(%arg0: i32, %arg1: i32) -> (i32, i32) {
    %c0_i32 = arith.constant 0 : i32
    %c0_i32_0 = arith.constant 0 : i32
    %c0_i32_1 = arith.constant 0 : i32
    return %c0_i32, %c0_i32_0 : i32, i32
  }
  func.func @transform_5(%arg0: i32, %arg1: i32) -> (i32, i32) {
    %c0_i32 = arith.constant 0 : i32
    %c0_i32_0 = arith.constant 0 : i32
    return %arg0, %c0_i32 : i32, i32
  }
}

</mosaic_0001>

<bundles_post_ra>
// kernel: forward.1
= control target key start
LH: loop header
LB: loop body
LE: loop exit
PB: predicated region body
PF: predicated region fallthrough
CT: control target
= control target key end

     0   :  { %v479_v2 = vmov 0.0   ;;  %s605_s0 = inlined_call_operand.vmem [shape: bf16[8,256], index: 0, kind: input, shape index: {}]   ;;  %s606_s1 = inlined_call_operand.vmem [shape: bf16[256,128], index: 1, kind: input, shape index: {}]   ;;  %s607_s2 = inlined_call_operand.vmem [shape: f32[1,128], index: 2, kind: input, shape index: {}, may-alias: {2,4}]   ;;  %s608_s3 = inlined_call_operand.vmem [shape: bf16[128,128], index: 3, kind: input, shape index: {}]   ;;  %s609_s4 = inlined_call_operand.vmem [shape: f32[1,128], index: 4, kind: input, shape index: {}, may-alias: {2,4}]   ;;  %s610_s5 = inlined_call_operand.hbm [shape: f32[8,128], index: 5, kind: output, shape index: {}]  }
   0x1   :  { %v429_v0 = vld [vmem:[%s606_s1 + $0x40] sm:$0xff]   ;;  %406 = vmatprep.subr.bf16.mxu1 %v479_v2  ;;  %v431_v3 = vld [vmem:[%s606_s1 + $0x48] sm:$0xff]   ;;  %v433_v5 = vld [vmem:[%s606_s1 + $0x50] sm:$0xff]  }
   0x2   :  { %v430_v1 = vld [vmem:[%s606_s1] sm:$0xff]   ;;  %375 = vmatprep.subr.bf16.mxu0 %v429_v0  ;;  %v432_v4 = vld [vmem:[%s606_s1 + $0x8] sm:$0xff]   ;;  %v434_v6 = vld [vmem:[%s606_s1 + $0x10] sm:$0xff]  }
   0x3   :  { %376 = vmatpush3.bf16.msra.mxu0 %v430_v1  ;;  %v435_v7 = vld [vmem:[%s606_s1 + $0x58] sm:$0xff]   ;;  %v437_v9 = vld [vmem:[%s606_s1 + $0x60] sm:$0xff]   ;;  %v439_v11 = vld [vmem:[%s606_s1 + $0x68] sm:$0xff]  }
   0x4   :  { %377 = vmatprep.subr.bf16.mxu0 %v431_v3  ;;  %v436_v8 = vld [vmem:[%s606_s1 + $0x18] sm:$0xff]   ;;  %v438_v10 = vld [vmem:[%s606_s1 + $0x20] sm:$0xff]   ;;  %v440_v15 = vld [vmem:[%s606_s1 + $0x28] sm:$0xff]  }
   0x5   :  { %v28_v12 = vld [vmem:[%s605_s0] sm:$0xff]  ;;  %v441_v16 = vld [vmem:[%s606_s1 + $0x70] sm:$0xff]   ;;  %v448_v17 = vld [vmem:[%s608_s3 + $0x8] sm:$0xff]  }
   0x6   :  { %v348_v13 = vcombine.high %v28_v12, %v28_v12  ;;  %v447_v14 = vld [vmem:[%s608_s3] sm:$0xff]   ;;  %v442_v18 = vld [vmem:[%s606_s1 + $0x30] sm:$0xff]  }
   0x7   :  { %378 = vmatpush3.bf16.msra.mxu0 %v432_v4  ;;  %407 = vmatpush3.bf16.msra.mxu1 %v447_v14 }
   0x8   :  { %379 = vmatprep.subr.bf16.mxu0 %v433_v5  ;;  %196 = vmatprep.mubr.bf16.mxu0 %v348_v13 }
   0x9   :  { %408 = vmatprep.subr.bf16.mxu1 %v479_v2 }
   0xb   :  { %380 = vmatpush3.bf16.msra.mxu0 %v434_v6 }
   0xc   :  { %381 = vmatprep.subr.bf16.mxu0 %v435_v7 }
   0xf   :  { %382 = vmatpush3.bf16.msra.mxu0 %v436_v8 }
  0x10   :  { %383 = vmatprep.subr.bf16.mxu0 %v437_v9 }
  0x13   :  { %384 = vmatpush3.bf16.msra.mxu0 %v438_v10 }
  0x14   :  { %385 = vmatprep.subr.bf16.mxu0 %v439_v11 }
  0x17   :  { %386 = vmatpush3.bf16.msra.mxu0 %v440_v15 }
  0x18   :  { %10 = vsyncpa [#allocation4], 0  ;;  %387 = vmatprep.subr.bf16.mxu0 %v441_v16  ;;  %v443_v19 = vld [vmem:[%s606_s1 + $0x78] sm:$0xff]   ;;  %409 = vmatpush3.bf16.msra.mxu1 %v448_v17  ;;  %v449_v20 = vld [vmem:[%s608_s3 + $0x10] sm:$0xff]   ;;  %v347_v23 = vcombine.low %v28_v12, %v28_v12  ;;  %vm480_vm0 = vmmov 0  }
  0x19   :  { %410 = vmatprep.subr.bf16.mxu1 %v479_v2  ;;  %v444_v21 = vld [vmem:[%s606_s1 + $0x38] sm:$0xff]   ;;  %v451_v24 = vld [vmem:[%s608_s3 + $0x20] sm:$0xff]   ;;  %v452_v25 = vld [vmem:[%s608_s3 + $0x28] sm:$0xff]   ;;  %422 = vmatprep.mubr.msk.bf16.mxu1 %vm480_vm0, %v479_v2 }
  0x1a   :  { %v450_v22 = vld [vmem:[%s608_s3 + $0x18] sm:$0xff]   ;;  %v453_v26 = vld [vmem:[%s608_s3 + $0x30] sm:$0xff]   ;;  %v365_v30 = vld [vmem:[%s607_s2] ss:$0 sm:$0xff] }
  0x1b   :  { %388 = vmatpush3.bf16.msra.mxu0 %v442_v18  ;;  %v454_v27 = vld [vmem:[%s608_s3 + $0x38] sm:$0xff]   ;;  %v366_v37 = vld [vmem:[%s609_s4] ss:$0 sm:$0xff]  ;;  %s481_s3 = smov [#allocation3]  }
  0x1c   :  { %389 = vmatprep.subr.bf16.mxu0 %v443_v19  ;;  %411 = vmatpush3.bf16.msra.mxu1 %v449_v20  ;;  %s339_s20 = sshll.u32 %s481_s3, 4  ;;  %s340_s20 = int_to_ptr.vmem [resolvable:$true] %s339_s20 }
  0x1d   :  { %412 = vmatprep.subr.bf16.mxu1 %v479_v2  ;;  %s455_s2 = scalar_lea.vmem %s340_s20, 128  ;;  %p460_p1 = scmp.lt.s32.totalorder %s340_s20, %s340_s20 }
  0x1e   :  { %p456_p0 = scmp.ne.s32.totalorder %s340_s20, %s455_s2  ;;  %p461_p2 = scmp.lt.s32.totalorder %s455_s2, %s455_s2 }
  0x1f   :  { %390 = vmatpush3.bf16.msra.mxu0 %v444_v21 }
  0x20   :  { %413 = vmatpush3.bf16.msra.mxu1 %v450_v22  ;;  %p462_p3 = por %p461_p2, %p460_p1 }
  0x21   :  { %414 = vmatprep.subr.bf16.mxu1 %v479_v2 }
  0x22   :  { %197 = vmatmul.mubr.bf16.vlgmr.msra.gmra.mrb[0].mxu0 %v347_v23  ;;  %p463_p4 = pnand %p462_p3, %p456_p0 }
  0x24   :  { %415 = vmatpush3.bf16.msra.mxu1 %v451_v24 }
  0x25   :  { %416 = vmatprep.subr.bf16.mxu1 %v479_v2 }
  0x28   :  { %417 = vmatpush3.bf16.msra.mxu1 %v452_v25 }
  0x29   :  { %418 = vmatprep.subr.bf16.mxu1 %v479_v2 }
  0x2c   :  { %419 = vmatpush3.bf16.msra.mxu1 %v453_v26 }
  0x2d   :  { %420 = vmatprep.subr.bf16.mxu1 %v479_v2 }
  0x30   :  { %421 = vmatpush3.bf16.msra.mxu1 %v454_v27 }
  0xf5   :  { %v391_v28 = vpop.f32.mrb[0].mxu0 }
  0xf6   :  { %v392_v29 = vpop.f32.mrb[1].mxu0 }
  0xf7   :  { %v393_v31 = vadd.f32 %v392_v29, %v391_v28  ;;  %v394_v32 = vpop.f32.mrb[2].mxu0 }
  0xf8   :  { %v395_v33 = vpop.f32.mrb[3].mxu0 }
  0xf9   :  { %v217_v34 = vadd.f32 %v393_v31, %v365_v30 }
  0xfb   :  { %v218_v35 = vmax.f32 %v217_v34, 0.0 }
  0xfd   :  { %v219_v36 = vpack.c.bf16 %v218_v35, %v218_v35 }
  0xff   :  { %423 = vmatmul.mubr.bf16.vlgmr.msra.gmra.mrb[0].mxu1 %v219_v36 }
 0x1d2   :  { %v325_v38 = vpop.f32.mrb[0].mxu1 }
 0x1d3   :  { %v326_v39 = vadd.f32 %v366_v37, %v325_v38  ;;  %v424_v40 = vpop.f32.mrb[1].mxu1 }
 0x1d4   :  { %v328_v41 = vpop.f32.mrb[2].mxu1 }
 0x1d5   :  { %v331_v42 = vmax.f32 %v326_v39, 0.0  ;;  %v425_v43 = vpop.f32.mrb[3].mxu1 }
 0x1d7   :  { %332 = vst [vmem:[#allocation3] sm:$0xff] %v331_v42 }
 0x1d8   :  { %466 = shalt.err (!%p463_p4)
}
 0x1d9   :  { %s467_s4 = scalar_lea.hbm %s610_s5, 128 }
 0x1da   :  { %p468_p5 = scmp.ne.s32.totalorder %s610_s5, %s467_s4  ;;  %p471_p6 = scmp.lt.u32.totalorder %s467_s4, %s610_s5 }
 0x1dc   :  { %p473_p7 = pnand %p471_p6, %p468_p5 }
 0x1de   :  { %476 = shalt.err (!%p473_p7)
}
 0x1df   :  { %342 = dma.vmem_to_hbm [thread:$0]  %s340_s20, 128, %s610_s5, [#allocation4]  }
 0x1e0   :  { %477 = dma.done.wait [#allocation4], 128  }
 0x1e1   :  { %478 = vsyncadd [#allocation4], 4294967168 }
 0x1e2   :  { %346 = vsyncpa [#allocation4], 1 }

</bundles_post_ra>
